<compile_context>
chip_gen: v5e
topology: v5e:2x2
jax: 0.10.0
libtpu: 0.0.40
codegen_flags: <defaults>
</compile_context>

<pallas_src>
import functools

import jax
import jax.numpy as jnp
from jax.experimental import pallas as pl
from jax.experimental.pallas import tpu as pltpu


# Tile-choice targets: with small N the op is HBM-bandwidth / per-step-overhead
# bound, so aim for ~1 MiB of x per grid step while keeping a few steps.
_TARGET_BLOCK_BYTES = 1 << 20             # ~1 MiB of x per block
_MAX_BLOCK_BYTES = 2 << 20                # soft cap on x bytes per block
_PREF_GRID_STEPS = 4                      # keep >= ~4 steps (pipelining + v7x 2 TCs)
_MAX_BB_UNROLL = 32                       # cap on per-block batch unroll
_RAGGED_FULL_EXTENT_MAX_BYTES = 8 << 20   # ragged-T full-extent block cap before padding
_PACK_MAX_BYTES = 4 << 20                 # tiny-T wrapper-packing cap


# ----------------------------------------------------------------------------
# Hardware queries (defensive: fall back to v7x-safe numbers)
# ----------------------------------------------------------------------------
def _vmem_budget_and_capacity():
    cap = 0
    try:
        cap = int(getattr(pltpu.get_tpu_info(), "vmem_capacity_bytes", 0) or 0)
    except Exception:
        cap = 0
    if cap <= 0:
        cap = 64 * 1024 * 1024            # v7x-safe lower bound
    # Tile-choice budget: half of physical VMEM (32 MiB on v7x, 64 MiB on v5e/v6e).
    budget = min(cap // 2, 96 * 1024 * 1024)
    return budget, cap


def _has_low_precision_valu():
    # v6e / v7x VPUs have native bf16 lanes; v5e and older do not.
    try:
        kind = jax.devices()[0].device_kind.lower()
    except Exception:
        return False
    return any(tag in kind for tag in ("v6", "v7", "7x"))


# ----------------------------------------------------------------------------
# Kernel
# ----------------------------------------------------------------------------
def _attn3d_kernel(x_ref, w_ref, b_ref, o_ref, *, mul_in_f32):
    """One (Bb, N, Tt) tile:  probs = W @ x + bias ;  out = x * probs.

    x_ref / o_ref : (Bb, N, Tt)  batch-block x time-tile
    w_ref         : (N, N)       nn.Linear weight (out_features, in_features), VMEM-resident
    b_ref         : (N, 1)       nn.Linear bias, broadcast over time
    """
    bb, n, tt = x_ref.shape
    w = w_ref[...]                                     # native dtype -> MXU (f32 accumulation)
    # Hoist the bias broadcast out of the unrolled loop (JAX does not CSE broadcast_in_dim).
    bias_bc = jnp.broadcast_to(b_ref[...].astype(jnp.float32), (n, tt))

    # Bb is small (<= 32): static unroll keeps everything visible to the scheduler.
    for b in range(bb):
        x = x_ref[b]                                                       # (N, Tt), native dtype
        probs = jnp.dot(w, x, preferred_element_type=jnp.float32) + bias_bc  # MXU, f32 acc
        if mul_in_f32:
            # v5e (no bf16 VALU) / f32 inputs: gate multiply in f32.
            y = x.astype(jnp.float32) * probs
        else:
            # v6e / v7x: native low-precision gate multiply (half the VALU ops / vregs).
            y = x * probs.astype(x.dtype)
        o_ref[b] = y.astype(o_ref.dtype)


# ----------------------------------------------------------------------------
# VMEM accounting & tile selection
# ----------------------------------------------------------------------------
def _block_vmem_bytes(bb, n, tt, x_dtype, out_dtype, w_dtype, b_dtype):
    x_i = jnp.dtype(x_dtype).itemsize
    o_i = jnp.dtype(out_dtype).itemsize
    w_i = jnp.dtype(w_dtype).itemsize
    b_i = jnp.dtype(b_dtype).itemsize
    io = 2 * bb * n * tt * (x_i + o_i)            # double-buffered x input + output blocks
    wb = 2 * (n * n * w_i + n * b_i)              # W / bias are double-buffered by the pipeline too
    return io + wb


def _choose_tiles(B, N, T, tt_cands, x_dtype, out_dtype, w_dtype, b_dtype, budget):
    """Pick (bb, tt): maximize per-step bytes (~1 MiB of x) while keeping a few grid steps."""
    x_i = jnp.dtype(x_dtype).itemsize
    bb_cands = [d for d in range(1, min(B, _MAX_BB_UNROLL) + 1) if B % d == 0]
    max_steps = max(B * (T // min(tt_cands)), 1)
    want_steps = min(_PREF_GRID_STEPS, max_steps)

    best, best_key = None, None
    for tt in tt_cands:
        for bb in bb_cands:
            if _block_vmem_bytes(bb, N, tt, x_dtype, out_dtype, w_dtype, b_dtype) > budget:
                continue
            xb = bb * N * tt * x_i
            steps = (B // bb) * (T // tt)
            key = (
                steps >= want_steps,                 # keep enough steps (pipelining / 2 TCs)
                xb <= _MAX_BLOCK_BYTES,              # don't blow past ~2 MiB of x per block
                -abs(xb - _TARGET_BLOCK_BYTES),      # prefer ~1 MiB of x per block
                tt,                                  # tie-break: bigger lane-dense dots
                -bb,                                 # tie-break: smaller unroll
            )
            if best_key is None or key > best_key:
                best, best_key = (bb, tt), key
    if best is None:
        best = (1, min(tt_cands))                    # last resort (always tiny)
    return best


# ----------------------------------------------------------------------------
# pallas_call wrapper (x already laid out (B, N, T) with T-tiling-friendly T)
# ----------------------------------------------------------------------------
def _attn3d_call(x, weight, bias2d, budget, cap):
    B, N, T = x.shape
    out_dtype = x.dtype

    if T % 128 == 0:
        tt_cands = [d for d in range(128, T + 1, 128) if T % d == 0]   # lane-dense tiles
    else:
        tt_cands = [T]                                                  # full-extent block

    bb, tt = _choose_tiles(B, N, T, tt_cands, x.dtype, out_dtype, weight.dtype,
                           bias2d.dtype, budget)
    grid = (B // bb, T // tt)

    mul_in_f32 = (jnp.dtype(x.dtype).itemsize >= 4) or (not _has_low_precision_valu())

    est = _block_vmem_bytes(bb, N, tt, x.dtype, out_dtype, weight.dtype, bias2d.dtype)
    vmem_limit = int(min(0.9 * cap, max(est + (8 << 20), 32 << 20)))

    kernel = functools.partial(_attn3d_kernel, mul_in_f32=mul_in_f32)
    return pl.pallas_call(
        kernel,
        out_shape=jax.ShapeDtypeStruct((B, N, T), out_dtype),
        grid_spec=pltpu.PrefetchScalarGridSpec(
            num_scalar_prefetch=0,
            grid=grid,
            in_specs=[
                pl.BlockSpec((bb, N, tt), lambda bi, ti: (bi, 0, ti)),
                pl.BlockSpec((N, N), lambda bi, ti: (0, 0)),   # weight: VMEM-resident
                pl.BlockSpec((N, 1), lambda bi, ti: (0, 0)),   # bias:   VMEM-resident
            ],
            out_specs=pl.BlockSpec((bb, N, tt), lambda bi, ti: (bi, 0, ti)),
        ),
        compiler_params=pltpu.CompilerParams(
            dimension_semantics=("parallel", "parallel"),
            vmem_limit_bytes=vmem_limit,
        ),
    )(x, weight, bias2d)


# ----------------------------------------------------------------------------
# Public wrapper
# ----------------------------------------------------------------------------
def attention3d_block(x, weight, bias):
    """x: (B, N, T); weight: (N, N) nn.Linear weight; bias: (N,). Returns (B, N, T)."""
    B, N, T = x.shape
    bias2d = bias.reshape(N, 1)
    x_item = jnp.dtype(x.dtype).itemsize
    budget, cap = _vmem_budget_and_capacity()

    # Tiny-T regime: pack batches into the lane axis in the wrapper (layout plumbing)
    # so the kernel issues one lane-dense dot instead of B masked (<128-lane) ones.
    if T < 128 and B > 1 and B * N * T * x_item <= min(_PACK_MAX_BYTES, budget // 8):
        x2 = jnp.transpose(x, (1, 0, 2)).reshape(1, N, B * T)
        out2 = _attn3d_call(x2, weight, bias2d, budget, cap)
        return jnp.transpose(out2.reshape(N, B, T), (1, 0, 2))

    # Ragged T (>=128, not a multiple of 128): full-extent block only if it actually
    # fits; otherwise zero-pad T to a multiple of 128 and slice the result back.
    if T % 128 != 0 and T > 128:
        full_block = _block_vmem_bytes(1, N, T, x.dtype, x.dtype, weight.dtype, bias2d.dtype)
        if full_block > budget or N * T * x_item > _RAGGED_FULL_EXTENT_MAX_BYTES:
            Tp = ((T + 127) // 128) * 128
            xp = jnp.pad(x, ((0, 0), (0, 0), (0, Tp - T)))
            outp = _attn3d_call(xp, weight, bias2d, budget, cap)
            return outp[:, :, :T]

    return _attn3d_call(x, weight, bias2d, budget, cap)


# ----------------------------------------------------------------------------
# Pure-JAX reference matching the PyTorch forward exactly
# ----------------------------------------------------------------------------
def attention3d_block_ref(x, weight, bias):
    xf = x.astype(jnp.float32)
    xp = jnp.transpose(xf, (0, 2, 1))                                  # (B, T, N)
    y = jnp.einsum("btm,nm->btn", xp, weight.astype(jnp.float32)) + bias.astype(jnp.float32)
    x_probs = jnp.transpose(y, (0, 2, 1))                              # (B, N, T)
    return (xf * x_probs).astype(x.dtype)


if __name__ == "__main__":
    def _make_inputs(key, B, N, T, dtype):
        kx, kw, kb = jax.random.split(key, 3)
        x = jax.random.normal(kx, (B, N, T), jnp.float32).astype(dtype)
        bound = 1.0 / (N ** 0.5)                      # nn.Linear-style U(-1/sqrt(N), 1/sqrt(N))
        w = jax.random.uniform(kw, (N, N), jnp.float32, -bound, bound).astype(dtype)
        b = jax.random.uniform(kb, (N,), jnp.float32, -bound, bound).astype(dtype)
        return x, w, b

    root = jax.random.PRNGKey(0)
    keys = jax.random.split(root, 5)

    # 1) Module-typical tiny shape (batch=2, num_nodes=16, seq=8): wrapper-packed
    #    batch-into-lanes path, single lane-dense dot.
    x, w, b = _make_inputs(keys[0], 2, 16, 8, jnp.float32)
    out = jax.block_until_ready(attention3d_block(x, w, b))
    ref = attention3d_block_ref(x, w, b)
    assert out.shape == (2, 16, 8)
    assert jnp.allclose(out, ref, atol=1e-4, rtol=1e-4), "f32 tiny-T mismatch"

    # 2) Lane-dense streaming regime: tt=2048, grid (2, 2).
    x, w, b = _make_inputs(keys[1], 2, 16, 4096, jnp.float32)
    out = jax.block_until_ready(attention3d_block(x, w, b))
    ref = attention3d_block_ref(x, w, b)
    assert jnp.allclose(out, ref, atol=1e-4, rtol=1e-4), "f32 tiled mismatch"

    # 3) Batch-packed lane-dense blocks (Bb=2, tt=256): exercises the unrolled loop
    #    with the hoisted bias broadcast.
    x, w, b = _make_inputs(keys[2], 8, 16, 256, jnp.float32)
    out = jax.block_until_ready(attention3d_block(x, w, b))
    ref = attention3d_block_ref(x, w, b)
    assert jnp.allclose(out, ref, atol=1e-4, rtol=1e-4), "f32 batch-packed mismatch"

    # 4) Native bf16 operands straight to the MXU + low-precision gate multiply on v6e/v7x.
    x, w, b = _make_inputs(keys[3], 2, 16, 256, jnp.bfloat16)
    out = jax.block_until_ready(attention3d_block(x, w, b))
    ref = attention3d_block_ref(x, w, b)
    assert jnp.allclose(out.astype(jnp.float32), ref.astype(jnp.float32),
                        atol=1e-1, rtol=1e-1), "bf16 mismatch"

    # 5) Ragged T (>=128, not a multiple of 128): full-extent block path.
    x, w, b = _make_inputs(keys[4], 2, 16, 200, jnp.float32)
    out = jax.block_until_ready(attention3d_block(x, w, b))
    ref = attention3d_block_ref(x, w, b)
    assert jnp.allclose(out, ref, atol=1e-4, rtol=1e-4), "f32 ragged-T mismatch"

    print("KERNEL_OK")
</pallas_src>

<mosaic_0001>
module attributes {stable_mosaic.version = 11 : i64} {
  func.func @_attn3d_kernel(%arg0: i32, %arg1: i32, %arg2: memref<1x16x16xf32, #tpu.memory_space<vmem>>, %arg3: memref<16x16xf32, #tpu.memory_space<vmem>>, %arg4: memref<16x1xf32, #tpu.memory_space<vmem>>, %arg5: memref<1x16x16xf32, #tpu.memory_space<vmem>>) attributes {dimension_semantics = [#tpu.dimension_semantics<parallel>, #tpu.dimension_semantics<parallel>], iteration_bounds = array<i64: 1, 1>, scalar_prefetch = 0 : i64, scratch_operands = 0 : i64, tpu.core_type = #tpu.core_type<tc>, window_params = [{transform_indices = @transform_0, window_bounds = array<i64: 1, 16, 16>}, {pipeline_mode = #tpu.pipeline_mode<synchronous>, transform_indices = @transform_1, window_bounds = array<i64: 16, 16>}, {pipeline_mode = #tpu.pipeline_mode<synchronous>, transform_indices = @transform_2, window_bounds = array<i64: 16, 1>}, {transform_indices = @transform_3, window_bounds = array<i64: 1, 16, 16>}]} {
    %c0 = arith.constant 0 : index
    %c0_0 = arith.constant 0 : index
    %0 = vector.load %arg3[%c0, %c0_0] : memref<16x16xf32, #tpu.memory_space<vmem>>, vector<16x16xf32>
    %c0_1 = arith.constant 0 : index
    %c0_2 = arith.constant 0 : index
    %1 = vector.load %arg4[%c0_1, %c0_2] : memref<16x1xf32, #tpu.memory_space<vmem>>, vector<16x1xf32>
    %2 = vector.shape_cast %1 : vector<16x1xf32> to vector<16x1xf32>
    %3 = vector.broadcast %2 : vector<16x1xf32> to vector<16x16xf32>
    %c0_3 = arith.constant 0 : index
    %c0_4 = arith.constant 0 : index
    %c0_5 = arith.constant 0 : index
    %4 = vector.load %arg2[%c0_3, %c0_4, %c0_5] : memref<1x16x16xf32, #tpu.memory_space<vmem>>, vector<1x16x16xf32>
    %5 = vector.shape_cast %4 : vector<1x16x16xf32> to vector<16x16xf32>
    %cst = arith.constant dense<0.000000e+00> : vector<16x16xf32>
    %6 = tpu.matmul %0, %5, %cst {dimension_numbers = #tpu.dot_dimension_numbers<[1], [0], [0], [1], [0, 0, 1, 1], [], []>} : vector<16x16xf32>, vector<16x16xf32>, vector<16x16xf32> -> vector<16x16xf32>
    %7 = arith.addf %6, %3 : vector<16x16xf32>
    %8 = arith.mulf %5, %7 : vector<16x16xf32>
    %c0_6 = arith.constant 0 : index
    %c0_7 = arith.constant 0 : index
    %c0_8 = arith.constant 0 : index
    %9 = vector.load %arg5[%c0_6, %c0_7, %c0_8] : memref<1x16x16xf32, #tpu.memory_space<vmem>>, vector<1x16x16xf32>
    %10 = vector.shape_cast %9 : vector<1x16x16xf32> to vector<16x16xf32>
    %11 = vector.shape_cast %8 : vector<16x16xf32> to vector<1x16x16xf32>
    tpu.vector_store %arg5[%c0_6, %c0_7, %c0_8], %11 {strides = array<i32>} : memref<1x16x16xf32, #tpu.memory_space<vmem>>, vector<1x16x16xf32>,
    return
  }
  func.func @transform_0(%arg0: i32, %arg1: i32) -> (i32, i32, i32) {
    %c0_i32 = arith.constant 0 : i32
    %c0_i32_0 = arith.constant 0 : i32
    return %arg0, %c0_i32, %arg1 : i32, i32, i32
  }
  func.func @transform_1(%arg0: i32, %arg1: i32) -> (i32, i32) {
    %c0_i32 = arith.constant 0 : i32
    %c0_i32_0 = arith.constant 0 : i32
    %c0_i32_1 = arith.constant 0 : i32
    return %c0_i32, %c0_i32_0 : i32, i32
  }
  func.func @transform_2(%arg0: i32, %arg1: i32) -> (i32, i32) {
    %c0_i32 = arith.constant 0 : i32
    %c0_i32_0 = arith.constant 0 : i32
    %c0_i32_1 = arith.constant 0 : i32
    return %c0_i32, %c0_i32_0 : i32, i32
  }
  func.func @transform_3(%arg0: i32, %arg1: i32) -> (i32, i32, i32) {
    %c0_i32 = arith.constant 0 : i32
    %c0_i32_0 = arith.constant 0 : i32
    return %arg0, %c0_i32, %arg1 : i32, i32, i32
  }
}

</mosaic_0001>

<bundles_post_ra>
// kernel: tpu_custom_call.1
= control target key start
LH: loop header
LB: loop body
LE: loop exit
PB: predicated region body
PF: predicated region fallthrough
CT: control target
= control target key end

     0   :  { %8 = vsyncpa [#allocation3], 0  ;;  %s215_s0 = inlined_call_operand.vmem [shape: f32[1,16,16], index: 0, kind: input, shape index: {}]   ;;  %s216_s1 = inlined_call_operand.hbm [shape: f32[16,16], index: 1, kind: input, shape index: {}]   ;;  %s217_s2 = inlined_call_operand.vmem [shape: f32[16,1], index: 2, kind: input, shape index: {}]   ;;  %s218_s3 = inlined_call_operand.hbm [shape: f32[1,16,16], index: 3, kind: output, shape index: {}]  }
   0x1   :  { %9 = vsyncpa [#allocation4], 0  ;;  %s16_s14 = sshll.u32 %s216_s1, 4  ;;  %s162_s15 = smov [#allocation2]   ;;  %s17_s14 = int_to_ptr.hbm [resolvable:$true] %s16_s14 }
   0x2   :  { %s18_s16 = sshll.u32 %s162_s15, 4  ;;  %s163_s17 = smov 128   ;;  %s19_s16 = int_to_ptr.vmem [resolvable:$true] %s18_s16 }
   0x3   :  { %s164_s18 = smov 8  }
   0x4   :  { %24 = dma.hbm_to_vmem [thread:$0]  %s17_s14, 256, %s19_s16, [#allocation3], %s163_s17, %s163_s17, %s164_s18  }
   0x5   :  { %158 = dma.done.wait [#allocation3], 256  }
   0x6   :  { %159 = vsyncadd [#allocation3], 4294967040  ;;  %v165_v0 = vmov 0   ;;  %v46_v1 = vld [vmem:[%s215_s0 + $0x8] sm:$0xff]  ;;  %v33_v2 = vld [vmem:[%s217_s2] sm:$0xff]  ;;  %vm47_vm0 = vcmask 130048  }
   0x7   :  { %109 = vset.pattern.permute.xlu0 %v165_v0  ;;  %v45_v3 = vld [vmem:[%s215_s0] sm:$0xff]  ;;  %68 = vmatpush.msra.mxu0 %v46_v1  ;;  %v32_v5 = vld [vmem:[#allocation2 + $0x8] sm:$0xff]  ;;  %s166_s0 = smov [#allocation5]   ;;  %s87_s29 = sshll.u32 %s218_s3, 4  ;;  %s88_s29 = int_to_ptr.hbm [resolvable:$true] %s87_s29 }
   0x8   :  { %102 = vmatpush.msra.mxu1 %v46_v1  ;;  %v31_v4 = vld [vmem:[#allocation2] sm:$0xff]  ;;  %37 = vperm.xlu0 %109, %v33_v2   ;;  %v34_v6 = vld [vmem:[%s217_s2 + $0x8] sm:$0xff]  ;;  %s85_s26 = sshll.u32 %s166_s0, 4  ;;  %s86_s26 = int_to_ptr.vmem [resolvable:$true] %s85_s26 }
   0x9   :  { %69 = vmatpush.msra.mxu0 %v45_v3 }
   0xa   :  { %103 = vmatpush.msra.mxu1 %v45_v3  ;;  %100 = vmatmul.msk.f32.vlgmr.msra.gmra.mxu0 %vm47_vm0, %v31_v4 }
   0xb   :  { %101 = vmatmul.msk.f32.vlgmr.msra.gmra.mxu1 %vm47_vm0, %v32_v5 }
  0x10   :  { %42 = vperm.xlu0 %109, %v34_v6  }
  0x7a   :  { %v38_v7 = vpop.permute.xlu0 %37 }
  0x82   :  { %v43_v8 = vpop.permute.xlu0 %42 }
  0x87   :  { %v71_v9 = vpop.f32.mrf.mxu0 }
  0x88   :  { %v74_v10 = vpop.f32.mrf.mxu1  ;;  %v72_v11 = vadd.f32 %v71_v9, %v38_v7 }
  0x89   :  { %v75_v12 = vadd.f32 %v74_v10, %v43_v8 }
  0x8a   :  { %v77_v13 = vmul.f32 %v72_v11, %v45_v3 }
  0x8b   :  { %v78_v14 = vmul.f32 %v75_v12, %v46_v1 }
  0x8c   :  { %79 = vst.msk [vmem:[#allocation5] sm:$0xff] %vm47_vm0, %v77_v13 }
  0x8d   :  { %80 = vst.msk [vmem:[#allocation5 + $0x8] sm:$0xff] %vm47_vm0, %v78_v14 }
  0x8e   :  { %93 = dma.vmem_to_hbm [thread:$0]  %s86_s26, 256, %s88_s29, [#allocation4], %s163_s17, %s163_s17, %s164_s18  }
  0x8f   :  { %160 = dma.done.wait [#allocation4], 256  }
  0x90   :  { %161 = vsyncadd [#allocation4], 4294967040 }
  0x91   :  { %98 = vsyncpa [#allocation3], 1 }
  0x92   :  { %99 = vsyncpa [#allocation4], 1 }

</bundles_post_ra>
